<compile_context>
chip_gen: v7x
topology: tpu7x:2x2x1
jax: 0.10.0
libtpu: 0.0.40
codegen_flags: <defaults>
</compile_context>

<pallas_src>
import jax
import jax.numpy as jnp
from jax.experimental import pallas as pl
from jax.experimental.pallas import tpu as pltpu


def _round_up(x, m):
    return (x + m - 1) // m * m


def _mlp_kernel(x_ref, w1_ref, b1_ref, w2_ref, b2_ref, w3t_ref, b3_ref, o_ref):
    # Layer 1: single K=total_dim dot over the concatenated features + ReLU.
    # BN1 is folded into layer 2's weights (exact in eval mode, dropout = identity).
    h1 = jnp.dot(x_ref[...], w1_ref[...], preferred_element_type=jnp.float32)
    h1 = jnp.maximum(h1 + b1_ref[...], 0.0)

    # Layer 2: (BN1-folded) Linear -> ReLU.  BN2 is folded into layer 3.
    h2 = jnp.dot(h1.astype(w2_ref.dtype), w2_ref[...],
                 preferred_element_type=jnp.float32) + b2_ref[...]
    h2 = jnp.maximum(h2, 0.0)

    # Layer 3 computed transposed: (1, H) contracted against (tb, H) -> (1, tb),
    # giving a lane-dense output block (unmasked full-lane stores).
    logits = jax.lax.dot_general(
        w3t_ref[...], h2.astype(w3t_ref.dtype),
        dimension_numbers=(((1,), (1,)), ((), ())),
        preferred_element_type=jnp.float32) + b3_ref[...]
    o_ref[...] = logits.astype(o_ref.dtype)


def fold_params(params, dtype=jnp.float32):
    """Fold eval-mode BN affines into the following Linear layers.

    Matmul operands are cast to `dtype` (f32 or bf16); biases stay f32 since the
    kernel accumulates in f32.
    """
    s1, t1 = params["bn1_scale"], params["bn1_shift"]
    s2, t2 = params["bn2_scale"], params["bn2_shift"]
    w2, b2 = params["w2"], params["b2"]
    w3, b3 = params["w3"], params["b3"]

    w2f = w2 * s1.reshape(-1, 1)          # (2H, H)
    b2f = t1 @ w2 + b2                    # (1, H)
    w3f = w3 * s2.reshape(-1, 1)          # (H, 1)
    b3f = t2 @ w3 + b3                    # (1, 1)

    return dict(
        w1=params["w1"].astype(dtype), b1=params["b1"].astype(jnp.float32),
        w2=w2f.astype(dtype), b2=b2f.astype(jnp.float32),
        w3t=jnp.reshape(w3f, (1, -1)).astype(dtype),   # (1, H) row vector
        b3=b3f.astype(jnp.float32),
    )


def simple_concat_net_forward(expression, mutation, embedding, folded, *, block_b=4096):
    B = expression.shape[0]
    dtype = folded["w1"].dtype

    # One concatenated (B, total_dim) input tile per step (single DMA stream, one
    # K=total_dim dot) instead of three sub-128-lane tiles.
    x = jnp.concatenate([expression, mutation, embedding], axis=1).astype(dtype)
    D = x.shape[1]
    H2 = folded["b1"].shape[1]
    H = folded["b2"].shape[1]

    # Batch tile selection:
    #   * single tile (grid=1) when B fits in one block (sublane-aligned to 8);
    #   * otherwise a 128-multiple tile sized so there are >= 4 grid steps, keeping
    #     both v7x TensorCores fed via the "parallel" batch axis.
    if B <= block_b:
        tb = _round_up(B, 8)
    else:
        n_steps = max(4, pl.cdiv(B, block_b))
        tb = _round_up(pl.cdiv(B, n_steps), 128)
    padded_b = _round_up(B, tb)
    if padded_b != B:
        x = jnp.pad(x, ((0, padded_b - B), (0, 0)))   # zero rows: garbage-safe, sliced off
    grid = (padded_b // tb,)

    def const_spec(shape):
        # Same block every grid step -> weights/biases stay VMEM-resident.
        return pl.BlockSpec(shape, lambda i: (0, 0))

    in_specs = [
        pl.BlockSpec((tb, D), lambda i: (i, 0)),
        const_spec(folded["w1"].shape), const_spec(folded["b1"].shape),
        const_spec(folded["w2"].shape), const_spec(folded["b2"].shape),
        const_spec(folded["w3t"].shape), const_spec(folded["b3"].shape),
    ]
    # Lane-dense output: (1, padded_b) array, (1, tb) block along the lane axis.
    out_spec = pl.BlockSpec((1, tb), lambda i: (0, i))

    bpe = jnp.dtype(dtype).itemsize
    flops = 2 * padded_b * (D * H2 + H2 * H + H)
    bytes_accessed = int(padded_b * D * bpe + padded_b * 4
                         + (D * H2 + H2 * H + H) * bpe + (H2 + H + 1) * 4)

    out = pl.pallas_call(
        _mlp_kernel,
        out_shape=jax.ShapeDtypeStruct((1, padded_b), jnp.float32),
        grid=grid,
        in_specs=in_specs,
        out_specs=out_spec,
        compiler_params=pltpu.CompilerParams(
            dimension_semantics=("parallel",),
            # ~12 MiB worst case at tb=4096 f32 (inputs double-buffered + padded
            # intermediates); 32 MiB is safe on v5e (128 MiB phys) and within
            # v7x's 64 MiB physical VMEM per TensorCore.
            vmem_limit_bytes=32 * 1024 * 1024),
        cost_estimate=pl.CostEstimate(
            flops=flops, transcendentals=0, bytes_accessed=bytes_accessed),
    )(x, folded["w1"], folded["b1"], folded["w2"], folded["b2"],
      folded["w3t"], folded["b3"])

    # .squeeze() on the (B, 1) torch result -> (B,)
    return out[0, :B]


def init_params(key, expression_dim, mutation_dim, embedding_dim, hidden_size=32):
    total_dim = expression_dim + mutation_dim + embedding_dim
    h2 = hidden_size * 2
    keys = jax.random.split(key, 14)
    eps = 1e-5

    def lin(kw, kb, fan_in, fan_out):
        w = jax.random.normal(kw, (fan_in, fan_out), jnp.float32) * 0.02
        b = jax.random.normal(kb, (1, fan_out), jnp.float32) * 0.02
        return w, b

    w1, b1 = lin(keys[0], keys[1], total_dim, h2)
    w2, b2 = lin(keys[2], keys[3], h2, hidden_size)
    w3, b3 = lin(keys[4], keys[5], hidden_size, 1)

    def bn(kg, kb, km, kv, dim):
        gamma = 1.0 + 0.1 * jax.random.normal(kg, (1, dim), jnp.float32)
        beta = 0.1 * jax.random.normal(kb, (1, dim), jnp.float32)
        mean = 0.1 * jax.random.normal(km, (1, dim), jnp.float32)
        var = jax.random.uniform(kv, (1, dim), jnp.float32, 0.5, 1.5)
        scale = gamma / jnp.sqrt(var + eps)
        shift = beta - mean * scale
        return scale, shift

    bn1_scale, bn1_shift = bn(keys[6], keys[7], keys[8], keys[9], h2)
    bn2_scale, bn2_shift = bn(keys[10], keys[11], keys[12], keys[13], hidden_size)

    # TODO(synk): Dropout(0.3)/Dropout(0.2) are identity in eval mode; training-mode
    # stochastic masking (and training-mode BN batch statistics) intentionally not emulated.
    return dict(
        w1=w1, b1=b1, bn1_scale=bn1_scale, bn1_shift=bn1_shift,
        w2=w2, b2=b2, bn2_scale=bn2_scale, bn2_shift=bn2_shift,
        w3=w3, b3=b3,
    )


def _reference_forward(expression, mutation, embedding, p):
    x = jnp.concatenate([expression, mutation, embedding], axis=1)
    h1 = jnp.maximum(x @ p["w1"] + p["b1"], 0.0) * p["bn1_scale"] + p["bn1_shift"]
    h2 = jnp.maximum(h1 @ p["w2"] + p["b2"], 0.0) * p["bn2_scale"] + p["bn2_shift"]
    return jnp.squeeze(h2 @ p["w3"] + p["b3"], axis=-1)


if __name__ == "__main__":
    expression_dim, mutation_dim, embedding_dim, hidden_size = 16, 8, 40, 32

    key = jax.random.PRNGKey(0)
    kp, kd = jax.random.split(key)
    params = init_params(kp, expression_dim, mutation_dim, embedding_dim, hidden_size)

    folded_f32 = fold_params(params, dtype=jnp.float32)
    folded_bf16 = fold_params(params, dtype=jnp.bfloat16)

    cases = [
        # (B, block_b, folded params, tolerance)
        (8,   4096, folded_f32, 1e-3),    # single tile, no padding
        (13,  4096, folded_f32, 1e-3),    # single tile, pad-to-8 tail
        (300, 128,  folded_f32, 1e-3),    # multi-step grid + tail padding
        (13,  4096, folded_bf16, 1e-1),   # bf16 weights/inputs, f32 accumulation
    ]
    for B, block_b, folded, tol in cases:
        keys = jax.random.split(jax.random.fold_in(kd, B), 3)
        expression = jax.random.normal(keys[0], (B, expression_dim), jnp.float32)
        mutation = jax.random.normal(keys[1], (B, mutation_dim), jnp.float32)
        embedding = jax.random.normal(keys[2], (B, embedding_dim), jnp.float32)

        out = simple_concat_net_forward(expression, mutation, embedding, folded,
                                        block_b=block_b)
        out = jax.block_until_ready(out)

        ref = _reference_forward(expression, mutation, embedding, params)
        assert out.shape == (B,), out.shape
        assert jnp.allclose(out, ref, atol=tol, rtol=tol), \
            f"mismatch vs. pure-JAX reference (B={B}, dtype={folded['w1'].dtype})"

    print("KERNEL_OK")
</pallas_src>

<mosaic_0001>
module attributes {stable_mosaic.version = 11 : i64} {
  func.func @_mlp_kernel(%arg0: i32, %arg1: memref<8x64xf32, #tpu.memory_space<vmem>>, %arg2: memref<64x64xf32, #tpu.memory_space<vmem>>, %arg3: memref<1x64xf32, #tpu.memory_space<vmem>>, %arg4: memref<64x32xf32, #tpu.memory_space<vmem>>, %arg5: memref<1x32xf32, #tpu.memory_space<vmem>>, %arg6: memref<1x32xf32, #tpu.memory_space<vmem>>, %arg7: memref<1x1xf32, #tpu.memory_space<vmem>>, %arg8: memref<1x8xf32, #tpu.memory_space<vmem>>) attributes {dimension_semantics = [#tpu.dimension_semantics<parallel>], iteration_bounds = array<i64: 1>, scalar_prefetch = 0 : i64, scratch_operands = 0 : i64, tpu.core_type = #tpu.core_type<tc>, window_params = [{transform_indices = @transform_0, window_bounds = array<i64: 8, 64>}, {pipeline_mode = #tpu.pipeline_mode<synchronous>, transform_indices = @transform_1, window_bounds = array<i64: 64, 64>}, {pipeline_mode = #tpu.pipeline_mode<synchronous>, transform_indices = @transform_2, window_bounds = array<i64: 1, 64>}, {pipeline_mode = #tpu.pipeline_mode<synchronous>, transform_indices = @transform_3, window_bounds = array<i64: 64, 32>}, {pipeline_mode = #tpu.pipeline_mode<synchronous>, transform_indices = @transform_4, window_bounds = array<i64: 1, 32>}, {pipeline_mode = #tpu.pipeline_mode<synchronous>, transform_indices = @transform_5, window_bounds = array<i64: 1, 32>}, {pipeline_mode = #tpu.pipeline_mode<synchronous>, transform_indices = @transform_6, window_bounds = array<i64: 1, 1>}, {transform_indices = @transform_7, window_bounds = array<i64: 1, 8>}]} {
    %c0 = arith.constant 0 : index
    %c0_0 = arith.constant 0 : index
    %0 = vector.load %arg1[%c0, %c0_0] : memref<8x64xf32, #tpu.memory_space<vmem>>, vector<8x64xf32>
    %c0_1 = arith.constant 0 : index
    %c0_2 = arith.constant 0 : index
    %1 = vector.load %arg2[%c0_1, %c0_2] : memref<64x64xf32, #tpu.memory_space<vmem>>, vector<64x64xf32>
    %cst = arith.constant dense<0.000000e+00> : vector<8x64xf32>
    %2 = tpu.matmul %0, %1, %cst {dimension_numbers = #tpu.dot_dimension_numbers<[1], [0], [0], [1], [0, 0, 1, 1], [], []>} : vector<8x64xf32>, vector<64x64xf32>, vector<8x64xf32> -> vector<8x64xf32>
    %c0_3 = arith.constant 0 : index
    %c0_4 = arith.constant 0 : index
    %3 = vector.load %arg3[%c0_3, %c0_4] : memref<1x64xf32, #tpu.memory_space<vmem>>, vector<1x64xf32>
    %4 = vector.broadcast %3 : vector<1x64xf32> to vector<8x64xf32>
    %5 = arith.addf %2, %4 : vector<8x64xf32>
    %cst_5 = arith.constant 0.000000e+00 : f32
    %6 = vector.broadcast %cst_5 : f32 to vector<8x64xf32>
    %7 = arith.maximumf %5, %6 : vector<8x64xf32>
    %c0_6 = arith.constant 0 : index
    %c0_7 = arith.constant 0 : index
    %8 = vector.load %arg4[%c0_6, %c0_7] : memref<64x32xf32, #tpu.memory_space<vmem>>, vector<64x32xf32>
    %cst_8 = arith.constant dense<0.000000e+00> : vector<8x32xf32>
    %9 = tpu.matmul %7, %8, %cst_8 {dimension_numbers = #tpu.dot_dimension_numbers<[1], [0], [0], [1], [0, 0, 1, 1], [], []>} : vector<8x64xf32>, vector<64x32xf32>, vector<8x32xf32> -> vector<8x32xf32>
    %c0_9 = arith.constant 0 : index
    %c0_10 = arith.constant 0 : index
    %10 = vector.load %arg5[%c0_9, %c0_10] : memref<1x32xf32, #tpu.memory_space<vmem>>, vector<1x32xf32>
    %11 = vector.broadcast %10 : vector<1x32xf32> to vector<8x32xf32>
    %12 = arith.addf %9, %11 : vector<8x32xf32>
    %cst_11 = arith.constant 0.000000e+00 : f32
    %13 = vector.broadcast %cst_11 : f32 to vector<8x32xf32>
    %14 = arith.maximumf %12, %13 : vector<8x32xf32>
    %c0_12 = arith.constant 0 : index
    %c0_13 = arith.constant 0 : index
    %15 = vector.load %arg6[%c0_12, %c0_13] : memref<1x32xf32, #tpu.memory_space<vmem>>, vector<1x32xf32>
    %cst_14 = arith.constant dense<0.000000e+00> : vector<1x8xf32>
    %16 = tpu.matmul %15, %14, %cst_14 {dimension_numbers = #tpu.dot_dimension_numbers<[1], [1], [0], [0], [0, 0, 1, 0], [], []>} : vector<1x32xf32>, vector<8x32xf32>, vector<1x8xf32> -> vector<1x8xf32>
    %c0_15 = arith.constant 0 : index
    %c0_16 = arith.constant 0 : index
    %17 = vector.load %arg7[%c0_15, %c0_16] : memref<1x1xf32, #tpu.memory_space<vmem>>, vector<1x1xf32>
    %18 = vector.broadcast %17 : vector<1x1xf32> to vector<1x8xf32>
    %19 = arith.addf %16, %18 : vector<1x8xf32>
    %c0_17 = arith.constant 0 : index
    %c0_18 = arith.constant 0 : index
    %20 = vector.load %arg8[%c0_17, %c0_18] : memref<1x8xf32, #tpu.memory_space<vmem>>, vector<1x8xf32>
    tpu.vector_store %arg8[%c0_17, %c0_18], %19 {strides = array<i32>} : memref<1x8xf32, #tpu.memory_space<vmem>>, vector<1x8xf32>,
    return
  }
  func.func @transform_0(%arg0: i32) -> (i32, i32) {
    %c0_i32 = arith.constant 0 : i32
    %c0_i32_0 = arith.constant 0 : i32
    return %arg0, %c0_i32 : i32, i32
  }
  func.func @transform_1(%arg0: i32) -> (i32, i32) {
    %c0_i32 = arith.constant 0 : i32
    %c0_i32_0 = arith.constant 0 : i32
    %c0_i32_1 = arith.constant 0 : i32
    return %c0_i32, %c0_i32_0 : i32, i32
  }
  func.func @transform_2(%arg0: i32) -> (i32, i32) {
    %c0_i32 = arith.constant 0 : i32
    %c0_i32_0 = arith.constant 0 : i32
    %c0_i32_1 = arith.constant 0 : i32
    return %c0_i32, %c0_i32_0 : i32, i32
  }
  func.func @transform_3(%arg0: i32) -> (i32, i32) {
    %c0_i32 = arith.constant 0 : i32
    %c0_i32_0 = arith.constant 0 : i32
    %c0_i32_1 = arith.constant 0 : i32
    return %c0_i32, %c0_i32_0 : i32, i32
  }
  func.func @transform_4(%arg0: i32) -> (i32, i32) {
    %c0_i32 = arith.constant 0 : i32
    %c0_i32_0 = arith.constant 0 : i32
    %c0_i32_1 = arith.constant 0 : i32
    return %c0_i32, %c0_i32_0 : i32, i32
  }
  func.func @transform_5(%arg0: i32) -> (i32, i32) {
    %c0_i32 = arith.constant 0 : i32
    %c0_i32_0 = arith.constant 0 : i32
    %c0_i32_1 = arith.constant 0 : i32
    return %c0_i32, %c0_i32_0 : i32, i32
  }
  func.func @transform_6(%arg0: i32) -> (i32, i32) {
    %c0_i32 = arith.constant 0 : i32
    %c0_i32_0 = arith.constant 0 : i32
    %c0_i32_1 = arith.constant 0 : i32
    return %c0_i32, %c0_i32_0 : i32, i32
  }
  func.func @transform_7(%arg0: i32) -> (i32, i32) {
    %c0_i32 = arith.constant 0 : i32
    %c0_i32_0 = arith.constant 0 : i32
    return %c0_i32, %arg0 : i32, i32
  }
}

</mosaic_0001>

<bundles_post_ra>
// kernel: tpu_custom_call.1
= control target key start
LH: loop header
LB: loop body
LE: loop exit
PB: predicated region body
PF: predicated region fallthrough
CT: control target
= control target key end

     0   :  { %s559_s0 = inlined_call_operand.vmem [shape: f32[8,64], index: 0, kind: input, shape index: {}]   ;;  %s560_s1 = inlined_call_operand.vmem [shape: f32[64,64], index: 1, kind: input, shape index: {}]   ;;  %s561_s2 = inlined_call_operand.vmem [shape: f32[1,64], index: 2, kind: input, shape index: {}]   ;;  %s562_s3 = inlined_call_operand.vmem [shape: f32[64,32], index: 3, kind: input, shape index: {}]   ;;  %s563_s4 = inlined_call_operand.vmem [shape: f32[1,32], index: 4, kind: input, shape index: {}]   ;;  %s564_s5 = inlined_call_operand.vmem [shape: f32[1,32], index: 5, kind: input, shape index: {}]   ;;  %s565_s6 = inlined_call_operand.<no memory space> [shape: f32[1,1], index: 6, kind: input, shape index: {}]   ;;  %s566_s7 = inlined_call_operand.hbm [shape: f32[1,8], index: 7, kind: output, shape index: {}]  }
   0x1   :  { %v12_v0 = vstv %s565_s6 }
   0x2   :  { %13 = vst [vmem:[#allocation2] sm:$0x1] %v12_v0 }
   0x3   :  { %v30_v1 = vld [vmem:[%s560_s1] sm:$0xff]  ;;  %v31_v2 = vld [vmem:[%s560_s1 + $0x8] sm:$0xff]  ;;  %v32_v3 = vld [vmem:[%s560_s1 + $0x10] sm:$0xff]  ;;  %v436_v4 = vmov 0.0|0.0   ;;  %vm437_vm0 = vmmov 0   ;;  %v438_v7 = vmov 0.0  }
   0x4   :  { %382 = vmatprep.subr.bf16.mxu0 %v436_v4  ;;  %v383_v5 = vpack.c.bf16 %v31_v2, %v30_v1  ;;  %v33_v6 = vld [vmem:[%s560_s1 + $0x18] sm:$0xff]  ;;  %355 = vmatprep.mubr.msk.f32.mxu0 %vm437_vm0, %v438_v7  ;;  %v120_v9 = vld [vmem:[%s562_s3] sm:$0xff]  ;;  %v121_v10 = vld [vmem:[%s562_s3 + $0x8] sm:$0xff] }
   0x5   :  { %394 = vmatprep.subr.bf16.mxu1 %v436_v4  ;;  %374 = vmatprep.mubr.msk.f32.mxu1 %vm437_vm0, %v438_v7  ;;  %v386_v8 = vpack.c.bf16 %v33_v6, %v32_v3  ;;  %v122_v11 = vld [vmem:[%s562_s3 + $0x10] sm:$0xff]  ;;  %v34_v12 = vld [vmem:[%s560_s1 + $0x20] sm:$0xff]  ;;  %v35_v13 = vld [vmem:[%s560_s1 + $0x28] sm:$0xff]  ;;  %v395_v14 = vpack.c.bf16 %v121_v10, %v120_v9 }
   0x6   :  { %384 = vmatpush3.bf16.msra.mxu0 %v383_v5  ;;  %v123_v15 = vld [vmem:[%s562_s3 + $0x18] sm:$0xff] }
   0x7   :  { %385 = vmatprep.subr.bf16.mxu0 %v436_v4 }
   0x8   :  { %14 = vsyncpa [#allocation4], 0  ;;  %396 = vmatpush3.bf16.msra.mxu1 %v395_v14  ;;  %v398_v16 = vpack.c.bf16 %v123_v15, %v122_v11  ;;  %v389_v17 = vpack.c.bf16 %v35_v13, %v34_v12  ;;  %v124_v18 = vld [vmem:[%s562_s3 + $0x20] sm:$0xff]  ;;  %v125_v19 = vld [vmem:[%s562_s3 + $0x28] sm:$0xff]  ;;  %vm45_vm1 = vcmask 523264   ;;  %v439_v34 = vmov 0  }
   0x9   :  { %397 = vmatprep.subr.bf16.mxu1 %v436_v4  ;;  %v36_v20 = vld [vmem:[%s560_s1 + $0x30] sm:$0xff]  ;;  %v37_v21 = vld [vmem:[%s560_s1 + $0x38] sm:$0xff]  ;;  %v401_v22 = vpack.c.bf16 %v125_v19, %v124_v18  ;;  %v29_v24 = vld [vmem:[%s559_s0] sm:$0xff]  ;;  %411 = vset.pattern.permute.xlu0 %v439_v34  ;;  %vm220_vm2 = vcmask 261120   ;;  %v216_v41 = vlaneseq  ;;  %s440_s14 = smov [#allocation3]   ;;  %vm297_vm3 = vcmask 57344  }
   0xa   :  { %387 = vmatpush3.bf16.msra.mxu0 %v386_v8  ;;  %v392_v23 = vpack.c.bf16 %v37_v21, %v36_v20  ;;  %v126_v25 = vld [vmem:[%s562_s3 + $0x30] sm:$0xff]  ;;  %v127_v26 = vld [vmem:[%s562_s3 + $0x38] sm:$0xff]  ;;  %v313_v28 = vld [vmem:[%s561_s2] ss:$0 sm:$0xff]  ;;  %s305_s15 = sshll.u32 %s440_s14, 4  ;;  %s306_s15 = int_to_ptr.vmem [resolvable:$true] %s305_s15 }
   0xb   :  { %388 = vmatprep.subr.bf16.mxu0 %v436_v4  ;;  %v404_v27 = vpack.c.bf16 %v127_v26, %v126_v25  ;;  %v210_v33 = vld [vmem:[#allocation2] sm:$0x1]  ;;  %v217_v42 = vshrl.u32 %v216_v41, 7  ;;  %s416_s16 = scalar_lea.vmem %s306_s15, 32  ;;  %p417_p1 = scmp.lt.s32.totalorder %s306_s15, %s306_s15 }
   0xc   :  { %399 = vmatpush3.bf16.msra.mxu1 %v398_v16  ;;  %213 = vperm.xlu0 %411, %v210_v33   ;;  %v315_v35 = vld [vmem:[%s563_s4] ss:$0 sm:$0xff]  ;;  %s412_s4 = scalar_lea.vmem %s306_s15, 16 }
   0xd   :  { %400 = vmatprep.subr.bf16.mxu1 %v436_v4  ;;  %v209_v40 = vld [vmem:[%s564_s5] sm:$0x1]  ;;  %v218_v43 = vsub.s32 0, %v217_v42  ;;  %p413_p0 = scmp.ne.s32.totalorder %s306_s15, %s412_s4  ;;  %p418_p2 = scmp.lt.s32.totalorder %s416_s16, %s412_s4 }
   0xe   :  { %390 = vmatpush3.bf16.msra.mxu0 %v389_v17 }
   0xf   :  { %391 = vmatprep.subr.bf16.mxu0 %v436_v4  ;;  %p419_p3 = por %p418_p2, %p417_p1 }
  0x10   :  { %402 = vmatpush3.bf16.msra.mxu1 %v401_v22 }
  0x11   :  { %403 = vmatprep.subr.bf16.mxu1 %v436_v4  ;;  %p420_p4 = pnand %p419_p3, %p413_p0 }
  0x12   :  { %393 = vmatpush3.bf16.msra.mxu0 %v392_v23 }
  0x13   :  { %377 = vmatprep.subr.mxu0 %v438_v7 }
  0x14   :  { %405 = vmatpush3.bf16.msra.mxu1 %v404_v27 }
  0x15   :  { %356 = vmatmul.mubr.msk.f32.vlgmr.msra.gmra.mrb[0].mxu0 %vm45_vm1, %v29_v24 }
  0x16   :  { %379 = vmatprep.mubr.msk.f32.mxu0 %vm437_vm0, %v438_v7 }
  0x8b   :  { %v214_v44 = vpop.permute.xlu0 %213 }
  0x8c   :  { %v219_v45 = vrot.slane %v214_v44, %v218_v43 }
  0xe8   :  { %v115_v29 = vpop.f32.mrb[0].mxu0 }
  0xe9   :  { %v116_v30 = vadd.f32 %v313_v28, %v115_v29  ;;  %v357_v31 = vpop.f32.mrb[1].mxu0 }
  0xeb   :  { %v119_v32 = vmax.f32 %v116_v30, 0.0 }
  0xed   :  { %375 = vmatmul.mubr.msk.f32.vlgmr.msra.gmra.mrb[0].mxu1 %vm45_vm1, %v119_v32 }
 0x1c0   :  { %v204_v36 = vpop.f32.mrb[0].mxu1 }
 0x1c1   :  { %v205_v37 = vadd.f32 %v315_v35, %v204_v36  ;;  %v376_v38 = vpop.f32.mrb[1].mxu1 }
 0x1c3   :  { %v208_v39 = vmax.f32 %v205_v37, 0.0 }
 0x1c5   :  { %378 = vmatpush3.xpose.msk.msra.mxu0 %vm220_vm2, %v208_v39 }
 0x1c8   :  { %380 = vmatmul.mubr.msk.f32.vlgmr.msra.gmra.mrb[2].mxu0 %vm220_vm2, %v209_v40 }
 0x29b   :  { %v293_v46 = vpop.f32.mrb[2].mxu0 }
 0x29c   :  { %v294_v47 = vadd.f32 %v293_v46, %v219_v45  ;;  %v381_v48 = vpop.f32.mrb[3].mxu0 }
 0x29e   :  { %298 = vst.msk [vmem:[#allocation3] sm:$0x1] %vm297_vm3, %v294_v47 }
 0x29f   :  { %423 = shalt.err (!%p420_p4)
}
 0x2a0   :  { %s424_s18 = scalar_lea.hbm %s566_s7, 16 }
 0x2a1   :  { %p425_p5 = scmp.ne.s32.totalorder %s566_s7, %s424_s18  ;;  %p428_p6 = scmp.lt.u32.totalorder %s424_s18, %s566_s7 }
 0x2a3   :  { %p430_p7 = pnand %p428_p6, %p425_p5 }
 0x2a5   :  { %433 = shalt.err (!%p430_p7)
}
 0x2a6   :  { %308 = dma.vmem_to_hbm [thread:$0]  %s306_s15, 16, %s566_s7, [#allocation4]  }
 0x2a7   :  { %434 = dma.done.wait [#allocation4], 16  }
 0x2a8   :  { %435 = vsyncadd [#allocation4], 4294967280 }
 0x2a9   :  { %312 = vsyncpa [#allocation4], 1 }

</bundles_post_ra>
